<compile_context>
chip_gen: v5e
topology: v5e:2x2
jax: 0.10.0
libtpu: 0.0.40
codegen_flags: <defaults>
</compile_context>

<pallas_src>
import jax
import jax.numpy as jnp
from jax import lax
from jax.experimental import pallas as pl
from jax.experimental.pallas import tpu as pltpu


def _round_up(x, m):
    return ((x + m - 1) // m) * m


def _make_rnn_kernel(T_real, TT, TB, unroll):
    needs_mask = (pl.cdiv(T_real, TT) * TT) != T_real

    def kernel(x_ref, wih_ref, whh_ref, b_ref, wfc_ref, bfc_ref,
               out_ref, xw_ref, h_ref):
        # x_ref   : (TT, TB, F)      current time-chunk of the input
        # wih_ref : (F, H_pad)       input->hidden weight (right-multiply form)
        # whh_ref : (H_pad, H_pad)   hidden->hidden weight
        # b_ref   : (1, H_pad)       b_ih + b_hh
        # wfc_ref : (1, H_pad)       fc weight as a row
        # bfc_ref : (1, 1)           fc bias
        # out_ref : (TB, 128)        lane-dense output (logit broadcast on lanes)
        # xw_ref  : (TT*TB, H_pad)   scratch: projected inputs for this chunk
        # h_ref   : (TB, H_pad)      scratch: hidden-state carry
        t_chunk = pl.program_id(1)
        n_chunks = pl.num_programs(1)

        @pl.when(t_chunk == 0)
        def _():
            h_ref[...] = jnp.zeros_like(h_ref)

        # ---- hoisted input projection: one big matmul per chunk ----------
        F = x_ref.shape[-1]
        x_flat = x_ref[...].reshape(TT * TB, F)
        xw_ref[...] = (jnp.dot(x_flat, wih_ref[...],
                               preferred_element_type=jnp.float32)
                       + b_ref[...])            # bias hoisted out of the loop

        whh = whh_ref[...]
        base_t = t_chunk * TT

        # ---- recurrence: only h @ W_hh remains on the serial path ---------
        def step(i, h):
            off = pl.multiple_of(i * TB, TB)
            pre = xw_ref[pl.ds(off, TB), :] + jnp.dot(
                h, whh, preferred_element_type=jnp.float32)
            h_new = jnp.tanh(pre)
            if needs_mask:
                h_new = jnp.where(base_t + i < T_real, h_new, h)
            return h_new

        h = lax.fori_loop(0, TT, step, h_ref[...], unroll=unroll)
        h_ref[...] = h

        @pl.when(t_chunk == n_chunks - 1)
        def _():
            # Linear(H, 1) + sigmoid as VPU multiply + lane reduction
            # (padded fc columns are zero, so the reduction is exact).
            logits = (jnp.sum(h * wfc_ref[...], axis=-1, keepdims=True)
                      + bfc_ref[...])
            out_ref[...] = jnp.broadcast_to(jax.nn.sigmoid(logits),
                                            out_ref.shape)

    return kernel


def rnn_forward(x_btf, params):
    """x_btf: (B, T, F) float32 -> (B,) float32 (matches torch .squeeze())."""
    wih, whh, b_ih, b_hh, w_fc, b_fc = params
    B, T, F = x_btf.shape
    H = whh.shape[0]
    f32 = jnp.float32

    # ---- padded, vreg/MXU-shaped sizes ------------------------------------
    H_pad = _round_up(max(H, 128), 128)          # lanes: multiple of 128
    B_pad = _round_up(max(B, 8), 8)              # sublanes: multiple of 8
    TB = B_pad if B_pad <= 128 else 128          # batch tile (parallel axis)
    B_pad = _round_up(B_pad, TB)
    TT = min(T, 32)                              # time chunk (streamed from HBM)
    T_pad = _round_up(T, TT)
    nb, nt = B_pad // TB, T_pad // TT

    # ---- host-side layout / padding (zero padding is exact) ---------------
    x_tbf = jnp.transpose(x_btf.astype(f32), (1, 0, 2))          # (T, B, F)
    x_tbf = jnp.pad(x_tbf, ((0, T_pad - T), (0, B_pad - B), (0, 0)))
    wih_t = jnp.pad(jnp.transpose(wih).astype(f32),
                    ((0, 0), (0, H_pad - H)))                     # (F, H_pad)
    whh_t = jnp.pad(jnp.transpose(whh).astype(f32),
                    ((0, H_pad - H), (0, H_pad - H)))             # (H_pad, H_pad)
    b = jnp.pad((b_ih + b_hh).astype(f32),
                (0, H_pad - H)).reshape(1, H_pad)                 # (1, H_pad)
    wfc_row = jnp.pad(w_fc.reshape(-1).astype(f32),
                      (0, H_pad - H)).reshape(1, H_pad)           # (1, H_pad)
    bfc = b_fc.reshape(1, 1).astype(f32)                          # (1, 1)

    unroll = True if TT <= 16 else 8
    kernel = _make_rnn_kernel(T, TT, TB, unroll)

    in_specs = [
        pl.BlockSpec((TT, TB, F), lambda bb, tt: (tt, bb, 0)),    # x chunk
        pl.BlockSpec((F, H_pad), lambda bb, tt: (0, 0)),          # W_ih
        pl.BlockSpec((H_pad, H_pad), lambda bb, tt: (0, 0)),      # W_hh
        pl.BlockSpec((1, H_pad), lambda bb, tt: (0, 0)),          # bias
        pl.BlockSpec((1, H_pad), lambda bb, tt: (0, 0)),          # fc weight row
        pl.BlockSpec((1, 1), lambda bb, tt: (0, 0)),              # fc bias
    ]
    out_spec = pl.BlockSpec((TB, 128), lambda bb, tt: (bb, 0))
    scratch_shapes = [
        pltpu.VMEM((TT * TB, H_pad), f32),       # projected inputs (per chunk)
        pltpu.VMEM((TB, H_pad), f32),            # hidden-state carry
    ]

    # VMEM budget: 2x (double-buffered) x-chunk + resident weights + scratch
    # + lane-dense output block, with headroom; capped well under v7x's 64 MiB.
    vmem_bytes = 4 * (2 * TT * TB * F
                      + F * H_pad + H_pad * H_pad + 2 * H_pad + 1
                      + TT * TB * H_pad + TB * H_pad
                      + 2 * TB * 128) + (2 << 20)
    vmem_bytes = int(min(max(vmem_bytes, 4 << 20), 48 << 20))

    cost = pl.CostEstimate(
        flops=2 * T * B_pad * (F + H_pad) * H_pad,
        transcendentals=T * B_pad * H_pad,
        bytes_accessed=4 * (T_pad * B_pad * F + F * H_pad + H_pad * H_pad
                            + B_pad * 128),
    )

    out = pl.pallas_call(
        kernel,
        out_shape=jax.ShapeDtypeStruct((B_pad, 128), f32),
        grid_spec=pltpu.PrefetchScalarGridSpec(
            num_scalar_prefetch=0,
            grid=(nb, nt),
            in_specs=in_specs,
            out_specs=out_spec,
            scratch_shapes=scratch_shapes,
        ),
        compiler_params=pltpu.CompilerParams(
            dimension_semantics=("parallel", "arbitrary"),
            vmem_limit_bytes=vmem_bytes,
        ),
        cost_estimate=cost,
    )(x_tbf, wih_t, whh_t, b, wfc_row, bfc)

    return out[:B, 0]  # squeeze -> (B,)


def init_params(key, nbr_features, hidden_size):
    """Deterministic init matching PyTorch shapes (uniform +-1/sqrt(H))."""
    k = 1.0 / jnp.sqrt(hidden_size)
    ks = jax.random.split(key, 6)
    wih = jax.random.uniform(ks[0], (hidden_size, nbr_features), jnp.float32, -k, k)
    whh = jax.random.uniform(ks[1], (hidden_size, hidden_size), jnp.float32, -k, k)
    b_ih = jax.random.uniform(ks[2], (hidden_size,), jnp.float32, -k, k)
    b_hh = jax.random.uniform(ks[3], (hidden_size,), jnp.float32, -k, k)
    w_fc = jax.random.uniform(ks[4], (1, hidden_size), jnp.float32, -k, k)
    b_fc = jax.random.uniform(ks[5], (1,), jnp.float32, -k, k)
    return (wih, whh, b_ih, b_hh, w_fc, b_fc)


def reference_forward(x_btf, params):
    """Pure-JAX reference of the PyTorch forward (for sanity check)."""
    wih, whh, b_ih, b_hh, w_fc, b_fc = params
    B, T, F = x_btf.shape
    H = whh.shape[0]
    h = jnp.zeros((B, H), jnp.float32)
    for t in range(T):
        h = jnp.tanh(x_btf[:, t, :] @ wih.T + b_ih + h @ whh.T + b_hh)
    return jax.nn.sigmoid(h @ w_fc.T + b_fc)[:, 0]


if __name__ == "__main__":
    B, T, F, H = 2, 8, 4, 32
    key = jax.random.PRNGKey(0)
    kx, kp = jax.random.split(key)
    x = jax.random.normal(kx, (B, T, F), jnp.float32)
    params = init_params(kp, F, H)

    out = rnn_forward(x, params)
    jax.block_until_ready(out)

    ref = reference_forward(x, params)
    assert out.shape == (B,)
    assert jnp.allclose(out, ref, atol=1e-5, rtol=1e-5), (out, ref)
    print("KERNEL_OK")
</pallas_src>

<mosaic_0001>
module attributes {stable_mosaic.version = 11 : i64} {
  func.func @kernel(%arg0: i32, %arg1: i32, %arg2: memref<8x8x4xf32, #tpu.memory_space<vmem>>, %arg3: memref<4x128xf32, #tpu.memory_space<vmem>>, %arg4: memref<128x128xf32, #tpu.memory_space<vmem>>, %arg5: memref<1x128xf32, #tpu.memory_space<vmem>>, %arg6: memref<1x128xf32, #tpu.memory_space<vmem>>, %arg7: memref<1x1xf32, #tpu.memory_space<vmem>>, %arg8: memref<8x128xf32, #tpu.memory_space<vmem>>, %arg9: memref<64x128xf32, #tpu.memory_space<vmem>>, %arg10: memref<8x128xf32, #tpu.memory_space<vmem>>) attributes {dimension_semantics = [#tpu.dimension_semantics<parallel>, #tpu.dimension_semantics<arbitrary>], iteration_bounds = array<i64: 1, 1>, scalar_prefetch = 0 : i64, scratch_operands = 2 : i64, tpu.core_type = #tpu.core_type<tc>, window_params = [{transform_indices = @transform_0, window_bounds = array<i64: 8, 8, 4>}, {pipeline_mode = #tpu.pipeline_mode<synchronous>, transform_indices = @transform_1, window_bounds = array<i64: 4, 128>}, {pipeline_mode = #tpu.pipeline_mode<synchronous>, transform_indices = @transform_2, window_bounds = array<i64: 128, 128>}, {pipeline_mode = #tpu.pipeline_mode<synchronous>, transform_indices = @transform_3, window_bounds = array<i64: 1, 128>}, {pipeline_mode = #tpu.pipeline_mode<synchronous>, transform_indices = @transform_4, window_bounds = array<i64: 1, 128>}, {pipeline_mode = #tpu.pipeline_mode<synchronous>, transform_indices = @transform_5, window_bounds = array<i64: 1, 1>}, {transform_indices = @transform_6, window_bounds = array<i64: 8, 128>}]} {
    %c0_i32 = arith.constant 0 : i32
    %0 = arith.cmpi eq, %arg1, %c0_i32 : i32
    %1 = arith.extui %0 : i1 to i32
    %c0_i32_0 = arith.constant 0 : i32
    %2 = arith.cmpi ne, %1, %c0_i32_0 : i32
    scf.if %2 {
      %cst_42 = arith.constant 0.000000e+00 : f32
      %73 = vector.broadcast %cst_42 : f32 to vector<8x128xf32>
      %c0_43 = arith.constant 0 : index
      %c0_44 = arith.constant 0 : index
      %74 = vector.load %arg10[%c0_43, %c0_44] : memref<8x128xf32, #tpu.memory_space<vmem>>, vector<8x128xf32>
      tpu.vector_store %arg10[%c0_43, %c0_44], %73 {strides = array<i32>} : memref<8x128xf32, #tpu.memory_space<vmem>>, vector<8x128xf32>,
    } else {
    }
    %c0 = arith.constant 0 : index
    %c0_1 = arith.constant 0 : index
    %c0_2 = arith.constant 0 : index
    %3 = vector.load %arg2[%c0, %c0_1, %c0_2] : memref<8x8x4xf32, #tpu.memory_space<vmem>>, vector<8x8x4xf32>
    %4 = vector.shape_cast %3 : vector<8x8x4xf32> to vector<64x4xf32>
    %c0_3 = arith.constant 0 : index
    %c0_4 = arith.constant 0 : index
    %5 = vector.load %arg3[%c0_3, %c0_4] : memref<4x128xf32, #tpu.memory_space<vmem>>, vector<4x128xf32>
    %cst = arith.constant dense<0.000000e+00> : vector<64x128xf32>
    %6 = tpu.matmul %4, %5, %cst {dimension_numbers = #tpu.dot_dimension_numbers<[1], [0], [0], [1], [0, 0, 1, 1], [], []>} : vector<64x4xf32>, vector<4x128xf32>, vector<64x128xf32> -> vector<64x128xf32>
    %c0_5 = arith.constant 0 : index
    %c0_6 = arith.constant 0 : index
    %7 = vector.load %arg5[%c0_5, %c0_6] : memref<1x128xf32, #tpu.memory_space<vmem>>, vector<1x128xf32>
    %8 = vector.broadcast %7 : vector<1x128xf32> to vector<64x128xf32>
    %9 = arith.addf %6, %8 : vector<64x128xf32>
    %c0_7 = arith.constant 0 : index
    %c0_8 = arith.constant 0 : index
    %10 = vector.load %arg9[%c0_7, %c0_8] : memref<64x128xf32, #tpu.memory_space<vmem>>, vector<64x128xf32>
    tpu.vector_store %arg9[%c0_7, %c0_8], %9 {strides = array<i32>} : memref<64x128xf32, #tpu.memory_space<vmem>>, vector<64x128xf32>,
    %c0_9 = arith.constant 0 : index
    %c0_10 = arith.constant 0 : index
    %11 = vector.load %arg4[%c0_9, %c0_10] : memref<128x128xf32, #tpu.memory_space<vmem>>, vector<128x128xf32>
    %c0_11 = arith.constant 0 : index
    %c0_12 = arith.constant 0 : index
    %12 = vector.load %arg10[%c0_11, %c0_12] : memref<8x128xf32, #tpu.memory_space<vmem>>, vector<8x128xf32>
    %c0_i32_13 = arith.constant 0 : i32
    %c8_i32 = arith.constant 8 : i32
    %13 = arith.muli %c0_i32_13, %c8_i32 : i32
    %14 = tpu.assume_multiple %13, 8 : i32
    %15 = arith.index_cast %14 : i32 to index
    %c0_14 = arith.constant 0 : index
    %16 = vector.load %arg9[%15, %c0_14] : memref<64x128xf32, #tpu.memory_space<vmem>>, vector<8x128xf32>
    %cst_15 = arith.constant dense<0.000000e+00> : vector<8x128xf32>
    %17 = tpu.matmul %12, %11, %cst_15 {dimension_numbers = #tpu.dot_dimension_numbers<[1], [0], [0], [1], [0, 0, 1, 1], [], []>} : vector<8x128xf32>, vector<128x128xf32>, vector<8x128xf32> -> vector<8x128xf32>
    %18 = arith.addf %16, %17 : vector<8x128xf32>
    %19 = math.tanh %18 : vector<8x128xf32>
    %c1_i32 = arith.constant 1 : i32
    %c8_i32_16 = arith.constant 8 : i32
    %20 = arith.muli %c1_i32, %c8_i32_16 : i32
    %21 = tpu.assume_multiple %20, 8 : i32
    %22 = arith.index_cast %21 : i32 to index
    %c0_17 = arith.constant 0 : index
    %23 = vector.load %arg9[%22, %c0_17] : memref<64x128xf32, #tpu.memory_space<vmem>>, vector<8x128xf32>
    %cst_18 = arith.constant dense<0.000000e+00> : vector<8x128xf32>
    %24 = tpu.matmul %19, %11, %cst_18 {dimension_numbers = #tpu.dot_dimension_numbers<[1], [0], [0], [1], [0, 0, 1, 1], [], []>} : vector<8x128xf32>, vector<128x128xf32>, vector<8x128xf32> -> vector<8x128xf32>
    %25 = arith.addf %23, %24 : vector<8x128xf32>
    %26 = math.tanh %25 : vector<8x128xf32>
    %c2_i32 = arith.constant 2 : i32
    %c8_i32_19 = arith.constant 8 : i32
    %27 = arith.muli %c2_i32, %c8_i32_19 : i32
    %28 = tpu.assume_multiple %27, 8 : i32
    %29 = arith.index_cast %28 : i32 to index
    %c0_20 = arith.constant 0 : index
    %30 = vector.load %arg9[%29, %c0_20] : memref<64x128xf32, #tpu.memory_space<vmem>>, vector<8x128xf32>
    %cst_21 = arith.constant dense<0.000000e+00> : vector<8x128xf32>
    %31 = tpu.matmul %26, %11, %cst_21 {dimension_numbers = #tpu.dot_dimension_numbers<[1], [0], [0], [1], [0, 0, 1, 1], [], []>} : vector<8x128xf32>, vector<128x128xf32>, vector<8x128xf32> -> vector<8x128xf32>
    %32 = arith.addf %30, %31 : vector<8x128xf32>
    %33 = math.tanh %32 : vector<8x128xf32>
    %c3_i32 = arith.constant 3 : i32
    %c8_i32_22 = arith.constant 8 : i32
    %34 = arith.muli %c3_i32, %c8_i32_22 : i32
    %35 = tpu.assume_multiple %34, 8 : i32
    %36 = arith.index_cast %35 : i32 to index
    %c0_23 = arith.constant 0 : index
    %37 = vector.load %arg9[%36, %c0_23] : memref<64x128xf32, #tpu.memory_space<vmem>>, vector<8x128xf32>
    %cst_24 = arith.constant dense<0.000000e+00> : vector<8x128xf32>
    %38 = tpu.matmul %33, %11, %cst_24 {dimension_numbers = #tpu.dot_dimension_numbers<[1], [0], [0], [1], [0, 0, 1, 1], [], []>} : vector<8x128xf32>, vector<128x128xf32>, vector<8x128xf32> -> vector<8x128xf32>
    %39 = arith.addf %37, %38 : vector<8x128xf32>
    %40 = math.tanh %39 : vector<8x128xf32>
    %c4_i32 = arith.constant 4 : i32
    %c8_i32_25 = arith.constant 8 : i32
    %41 = arith.muli %c4_i32, %c8_i32_25 : i32
    %42 = tpu.assume_multiple %41, 8 : i32
    %43 = arith.index_cast %42 : i32 to index
    %c0_26 = arith.constant 0 : index
    %44 = vector.load %arg9[%43, %c0_26] : memref<64x128xf32, #tpu.memory_space<vmem>>, vector<8x128xf32>
    %cst_27 = arith.constant dense<0.000000e+00> : vector<8x128xf32>
    %45 = tpu.matmul %40, %11, %cst_27 {dimension_numbers = #tpu.dot_dimension_numbers<[1], [0], [0], [1], [0, 0, 1, 1], [], []>} : vector<8x128xf32>, vector<128x128xf32>, vector<8x128xf32> -> vector<8x128xf32>
    %46 = arith.addf %44, %45 : vector<8x128xf32>
    %47 = math.tanh %46 : vector<8x128xf32>
    %c5_i32 = arith.constant 5 : i32
    %c8_i32_28 = arith.constant 8 : i32
    %48 = arith.muli %c5_i32, %c8_i32_28 : i32
    %49 = tpu.assume_multiple %48, 8 : i32
    %50 = arith.index_cast %49 : i32 to index
    %c0_29 = arith.constant 0 : index
    %51 = vector.load %arg9[%50, %c0_29] : memref<64x128xf32, #tpu.memory_space<vmem>>, vector<8x128xf32>
    %cst_30 = arith.constant dense<0.000000e+00> : vector<8x128xf32>
    %52 = tpu.matmul %47, %11, %cst_30 {dimension_numbers = #tpu.dot_dimension_numbers<[1], [0], [0], [1], [0, 0, 1, 1], [], []>} : vector<8x128xf32>, vector<128x128xf32>, vector<8x128xf32> -> vector<8x128xf32>
    %53 = arith.addf %51, %52 : vector<8x128xf32>
    %54 = math.tanh %53 : vector<8x128xf32>
    %c6_i32 = arith.constant 6 : i32
    %c8_i32_31 = arith.constant 8 : i32
    %55 = arith.muli %c6_i32, %c8_i32_31 : i32
    %56 = tpu.assume_multiple %55, 8 : i32
    %57 = arith.index_cast %56 : i32 to index
    %c0_32 = arith.constant 0 : index
    %58 = vector.load %arg9[%57, %c0_32] : memref<64x128xf32, #tpu.memory_space<vmem>>, vector<8x128xf32>
    %cst_33 = arith.constant dense<0.000000e+00> : vector<8x128xf32>
    %59 = tpu.matmul %54, %11, %cst_33 {dimension_numbers = #tpu.dot_dimension_numbers<[1], [0], [0], [1], [0, 0, 1, 1], [], []>} : vector<8x128xf32>, vector<128x128xf32>, vector<8x128xf32> -> vector<8x128xf32>
    %60 = arith.addf %58, %59 : vector<8x128xf32>
    %61 = math.tanh %60 : vector<8x128xf32>
    %c7_i32 = arith.constant 7 : i32
    %c8_i32_34 = arith.constant 8 : i32
    %62 = arith.muli %c7_i32, %c8_i32_34 : i32
    %63 = tpu.assume_multiple %62, 8 : i32
    %64 = arith.index_cast %63 : i32 to index
    %c0_35 = arith.constant 0 : index
    %65 = vector.load %arg9[%64, %c0_35] : memref<64x128xf32, #tpu.memory_space<vmem>>, vector<8x128xf32>
    %cst_36 = arith.constant dense<0.000000e+00> : vector<8x128xf32>
    %66 = tpu.matmul %61, %11, %cst_36 {dimension_numbers = #tpu.dot_dimension_numbers<[1], [0], [0], [1], [0, 0, 1, 1], [], []>} : vector<8x128xf32>, vector<128x128xf32>, vector<8x128xf32> -> vector<8x128xf32>
    %67 = arith.addf %65, %66 : vector<8x128xf32>
    %68 = math.tanh %67 : vector<8x128xf32>
    %c8_i32_37 = arith.constant 8 : i32
    %c0_38 = arith.constant 0 : index
    %c0_39 = arith.constant 0 : index
    %69 = vector.load %arg10[%c0_38, %c0_39] : memref<8x128xf32, #tpu.memory_space<vmem>>, vector<8x128xf32>
    tpu.vector_store %arg10[%c0_38, %c0_39], %68 {strides = array<i32>} : memref<8x128xf32, #tpu.memory_space<vmem>>, vector<8x128xf32>,
    %c0_i32_40 = arith.constant 0 : i32
    %70 = arith.cmpi eq, %arg1, %c0_i32_40 : i32
    %71 = arith.extui %70 : i1 to i32
    %c0_i32_41 = arith.constant 0 : i32
    %72 = arith.cmpi ne, %71, %c0_i32_41 : i32
    scf.if %72 {
      %c0_42 = arith.constant 0 : index
      %c0_43 = arith.constant 0 : index
      %73 = vector.load %arg6[%c0_42, %c0_43] : memref<1x128xf32, #tpu.memory_space<vmem>>, vector<1x128xf32>
      %74 = vector.broadcast %73 : vector<1x128xf32> to vector<8x128xf32>
      %75 = arith.mulf %68, %74 : vector<8x128xf32>
      %cst_44 = arith.constant dense<0.000000e+00> : vector<8xf32>
      %76 = vector.multi_reduction <add>, %75, %cst_44 [1] : vector<8x128xf32> to vector<8xf32>
      %77 = vector.shape_cast %76 : vector<8xf32> to vector<8x1xf32>
      %c0_45 = arith.constant 0 : index
      %c0_46 = arith.constant 0 : index
      %78 = vector.load %arg7[%c0_45, %c0_46] : memref<1x1xf32, #tpu.memory_space<vmem>>, vector<1x1xf32>
      %79 = vector.broadcast %78 : vector<1x1xf32> to vector<8x1xf32>
      %80 = arith.addf %77, %79 : vector<8x1xf32>
      %81 = arith.negf %80 : vector<8x1xf32>
      %82 = math.exp %81 : vector<8x1xf32>
      %cst_47 = arith.constant 1.000000e+00 : f32
      %83 = vector.broadcast %cst_47 : f32 to vector<8x1xf32>
      %84 = arith.addf %83, %82 : vector<8x1xf32>
      %85 = arith.divf %83, %84 : vector<8x1xf32>
      %86 = vector.shape_cast %85 : vector<8x1xf32> to vector<8x1xf32>
      %87 = vector.broadcast %86 : vector<8x1xf32> to vector<8x128xf32>
      %c0_48 = arith.constant 0 : index
      %c0_49 = arith.constant 0 : index
      %88 = vector.load %arg8[%c0_48, %c0_49] : memref<8x128xf32, #tpu.memory_space<vmem>>, vector<8x128xf32>
      tpu.vector_store %arg8[%c0_48, %c0_49], %87 {strides = array<i32>} : memref<8x128xf32, #tpu.memory_space<vmem>>, vector<8x128xf32>,
    } else {
    }
    return
  }
  func.func @transform_0(%arg0: i32, %arg1: i32) -> (i32, i32, i32) {
    %c0_i32 = arith.constant 0 : i32
    %c0_i32_0 = arith.constant 0 : i32
    return %arg1, %arg0, %c0_i32 : i32, i32, i32
  }
  func.func @transform_1(%arg0: i32, %arg1: i32) -> (i32, i32) {
    %c0_i32 = arith.constant 0 : i32
    %c0_i32_0 = arith.constant 0 : i32
    %c0_i32_1 = arith.constant 0 : i32
    return %c0_i32, %c0_i32_0 : i32, i32
  }
  func.func @transform_2(%arg0: i32, %arg1: i32) -> (i32, i32) {
    %c0_i32 = arith.constant 0 : i32
    %c0_i32_0 = arith.constant 0 : i32
    %c0_i32_1 = arith.constant 0 : i32
    return %c0_i32, %c0_i32_0 : i32, i32
  }
  func.func @transform_3(%arg0: i32, %arg1: i32) -> (i32, i32) {
    %c0_i32 = arith.constant 0 : i32
    %c0_i32_0 = arith.constant 0 : i32
    %c0_i32_1 = arith.constant 0 : i32
    return %c0_i32, %c0_i32_0 : i32, i32
  }
  func.func @transform_4(%arg0: i32, %arg1: i32) -> (i32, i32) {
    %c0_i32 = arith.constant 0 : i32
    %c0_i32_0 = arith.constant 0 : i32
    %c0_i32_1 = arith.constant 0 : i32
    return %c0_i32, %c0_i32_0 : i32, i32
  }
  func.func @transform_5(%arg0: i32, %arg1: i32) -> (i32, i32) {
    %c0_i32 = arith.constant 0 : i32
    %c0_i32_0 = arith.constant 0 : i32
    %c0_i32_1 = arith.constant 0 : i32
    return %c0_i32, %c0_i32_0 : i32, i32
  }
  func.func @transform_6(%arg0: i32, %arg1: i32) -> (i32, i32) {
    %c0_i32 = arith.constant 0 : i32
    %c0_i32_0 = arith.constant 0 : i32
    return %arg0, %c0_i32 : i32, i32
  }
}

</mosaic_0001>

<bundles_post_ra>
// kernel: tpu_custom_call.1
= control target key start
LH: loop header
LB: loop body
LE: loop exit
PB: predicated region body
PF: predicated region fallthrough
CT: control target
= control target key end

     0   :  { %s757_s0 = inlined_call_operand.vmem [shape: f32[8,8,4], index: 0, kind: input, shape index: {}]   ;;  %s758_s1 = inlined_call_operand.vmem [shape: f32[4,128], index: 1, kind: input, shape index: {}]   ;;  %s759_s2 = inlined_call_operand.hbm [shape: f32[128,128], index: 2, kind: input, shape index: {}]   ;;  %s760_s3 = inlined_call_operand.vmem [shape: f32[1,128], index: 3, kind: input, shape index: {}]   ;;  %s761_s4 = inlined_call_operand.vmem [shape: f32[1,128], index: 4, kind: input, shape index: {}]   ;;  %s762_s5 = inlined_call_operand.<no memory space> [shape: f32[1,1], index: 5, kind: input, shape index: {}]   ;;  %s763_s6 = inlined_call_operand.hbm [shape: f32[8,128], index: 6, kind: output, shape index: {}]  }
   0x1   :  { %v11_v0 = vstv %s762_s5 }
   0x2   :  { %12 = vst [vmem:[#allocation4] sm:$0x1] %v11_v0 }
   0x3   :  { %13 = vsyncpa [#allocation6], 0 }
   0x4   :  { %14 = vsyncpa [#allocation7], 0  ;;  %s23_s25 = sshll.u32 %s759_s2, 4  ;;  %s496_s26 = smov [#allocation5]   ;;  %s24_s25 = int_to_ptr.hbm [resolvable:$true] %s23_s25 }
   0x5   :  { %s25_s27 = sshll.u32 %s496_s26, 4  ;;  %s497_s28 = smov 128   ;;  %s26_s27 = int_to_ptr.vmem [resolvable:$true] %s25_s27 }
   0x6   :  { %s498_s29 = smov 8  }
   0x7   :  { %31 = dma.hbm_to_vmem [thread:$0]  %s24_s25, 2048, %s26_s27, [#allocation6], %s497_s28, %s497_s28, %s498_s29  }
   0x8   :  { %492 = dma.done.wait [#allocation6], 2048  }
   0x9   :  { %493 = vsyncadd [#allocation6], 4294965248  ;;  %v543_v1 = vld [vmem:[#allocation5 + $0x78] sm:$0xff]  ;;  %v545_v2 = vld [vmem:[#allocation5 + $0x70] sm:$0xff]  ;;  %vm85_vm0 = vcmask 1043456   ;;  %vm60_vm1 = vcmask 31744  }
   0xa   :  { %156 = vmatpush.msra.mxu1 %v543_v1  ;;  %180 = vmatpush.msra.mxu2 %v543_v1  ;;  %v549_v3 = vld [vmem:[#allocation5 + $0x68] sm:$0xff]  ;;  %v554_v4 = vld [vmem:[#allocation5 + $0x60] sm:$0xff]  ;;  %v564_v7 = vld [vmem:[#allocation5 + $0x58] sm:$0xff]  ;;  %v499_v19 = vmov 0.0   ;;  %s394_s26 = sshll.u32 %s763_s6, 4  ;;  %s395_s26 = int_to_ptr.hbm [resolvable:$true] %s394_s26 }
   0xb   :  { %204 = vmatpush.msra.mxu3 %v543_v1  ;;  %v55_v5 = vld [vmem:[%s758_s1] sm:$0xf]  ;;  %v570_v8 = vld [vmem:[#allocation5 + $0x50] sm:$0xff]  ;;  %v576_v9 = vld [vmem:[#allocation5 + $0x48] sm:$0xff] }
   0xc   :  { %157 = vmatpush.msra.mxu1 %v545_v2  ;;  %181 = vmatpush.msra.mxu2 %v545_v2  ;;  %v47_v6 = vld [vmem:[%s757_s0] sm:$0xff]  ;;  %v594_v12 = vld [vmem:[#allocation5 + $0x30] sm:$0xff]  ;;  %v600_v13 = vld [vmem:[#allocation5 + $0x28] sm:$0xff] }
   0xd   :  { %205 = vmatpush.msra.mxu3 %v545_v2  ;;  %404 = vmatpush.msk.msra.mxu0 %vm85_vm0, %v55_v5  ;;  %v582_v10 = vld [vmem:[#allocation5 + $0x40] sm:$0xff]  ;;  %v588_v11 = vld [vmem:[#allocation5 + $0x38] sm:$0xff]  ;;  %v618_v16 = vld [vmem:[#allocation5 + $0x10] sm:$0xff] }
   0xe   :  { %158 = vmatpush.msra.mxu1 %v549_v3  ;;  %405 = vmatmul.msk.f32.vlgmr.msra.gmra.mxu0 %vm60_vm1, %v47_v6  ;;  %v606_v14 = vld [vmem:[#allocation5 + $0x20] sm:$0xff]  ;;  %v612_v15 = vld [vmem:[#allocation5 + $0x18] sm:$0xff]  ;;  %v624_v17 = vld [vmem:[#allocation5 + $0x8] sm:$0xff]  ;;  %v500_v6 = vmov 0  }
   0xf   :  { %182 = vmatpush.msra.mxu2 %v549_v3  ;;  %206 = vmatpush.msra.mxu3 %v549_v3  ;;  %v630_v18 = vld [vmem:[#allocation5] sm:$0xff]  ;;  %v717_v21 = vld [vmem:[%s760_s3] ss:$0 sm:$0xff]  ;;  %v49_v27 = vld [vmem:[%s757_s0 + $0x10] sm:$0xff] }
  0x10   :  { %159 = vmatpush.msra.mxu1 %v554_v4  ;;  %300 = vmatpush.msrb.mxu0 %v543_v1  ;;  %v48_v20 = vld [vmem:[%s757_s0 + $0x8] sm:$0xff]  ;;  %v50_v33 = vld [vmem:[%s757_s0 + $0x18] sm:$0xff]  ;;  %v51_v39 = vld [vmem:[%s757_s0 + $0x20] sm:$0xff] }
  0x11   :  { %183 = vmatpush.msra.mxu2 %v554_v4  ;;  %207 = vmatpush.msra.mxu3 %v554_v4  ;;  %v52_v45 = vld [vmem:[%s757_s0 + $0x28] sm:$0xff]  ;;  %v53_v46 = vld [vmem:[%s757_s0 + $0x30] sm:$0xff]  ;;  %v54_v52 = vld [vmem:[%s757_s0 + $0x38] sm:$0xff] }
  0x12   :  { %160 = vmatpush.msra.mxu1 %v564_v7  ;;  %301 = vmatpush.msrb.mxu0 %v545_v2 }
  0x13   :  { %184 = vmatpush.msra.mxu2 %v564_v7  ;;  %208 = vmatpush.msra.mxu3 %v564_v7 }
  0x14   :  { %161 = vmatpush.msra.mxu1 %v570_v8  ;;  %302 = vmatpush.msrb.mxu0 %v549_v3 }
  0x15   :  { %185 = vmatpush.msra.mxu2 %v570_v8  ;;  %209 = vmatpush.msra.mxu3 %v570_v8 }
  0x16   :  { %162 = vmatpush.msra.mxu1 %v576_v9  ;;  %303 = vmatpush.msrb.mxu0 %v554_v4 }
  0x17   :  { %186 = vmatpush.msra.mxu2 %v576_v9  ;;  %210 = vmatpush.msra.mxu3 %v576_v9 }
  0x18   :  { %163 = vmatpush.msra.mxu1 %v582_v10  ;;  %304 = vmatpush.msrb.mxu0 %v564_v7 }
  0x19   :  { %187 = vmatpush.msra.mxu2 %v582_v10  ;;  %211 = vmatpush.msra.mxu3 %v582_v10 }
  0x1a   :  { %164 = vmatpush.msra.mxu1 %v588_v11  ;;  %305 = vmatpush.msrb.mxu0 %v570_v8 }
  0x1b   :  { %188 = vmatpush.msra.mxu2 %v588_v11  ;;  %212 = vmatpush.msra.mxu3 %v588_v11 }
  0x1c   :  { %165 = vmatpush.msra.mxu1 %v594_v12  ;;  %306 = vmatpush.msrb.mxu0 %v576_v9 }
  0x1d   :  { %189 = vmatpush.msra.mxu2 %v594_v12  ;;  %213 = vmatpush.msra.mxu3 %v594_v12 }
  0x1e   :  { %166 = vmatpush.msra.mxu1 %v600_v13  ;;  %307 = vmatpush.msrb.mxu0 %v582_v10 }
  0x1f   :  { %190 = vmatpush.msra.mxu2 %v600_v13  ;;  %214 = vmatpush.msra.mxu3 %v600_v13 }
  0x20   :  { %167 = vmatpush.msra.mxu1 %v606_v14  ;;  %308 = vmatpush.msrb.mxu0 %v588_v11 }
  0x21   :  { %191 = vmatpush.msra.mxu2 %v606_v14  ;;  %215 = vmatpush.msra.mxu3 %v606_v14 }
  0x22   :  { %168 = vmatpush.msra.mxu1 %v612_v15  ;;  %309 = vmatpush.msrb.mxu0 %v594_v12 }
  0x23   :  { %192 = vmatpush.msra.mxu2 %v612_v15  ;;  %216 = vmatpush.msra.mxu3 %v612_v15 }
  0x24   :  { %169 = vmatpush.msra.mxu1 %v618_v16  ;;  %310 = vmatpush.msrb.mxu0 %v600_v13 }
  0x25   :  { %193 = vmatpush.msra.mxu2 %v618_v16  ;;  %217 = vmatpush.msra.mxu3 %v618_v16 }
  0x26   :  { %170 = vmatpush.msra.mxu1 %v624_v17  ;;  %311 = vmatpush.msrb.mxu0 %v606_v14 }
  0x27   :  { %194 = vmatpush.msra.mxu2 %v624_v17  ;;  %218 = vmatpush.msra.mxu3 %v624_v17 }
  0x28   :  { %171 = vmatpush.msra.mxu1 %v630_v18  ;;  %312 = vmatpush.msrb.mxu0 %v612_v15 }
  0x29   :  { %172 = vmatmul.f32.vlgmr.msra.gmra.mxu1 %v499_v19  ;;  %195 = vmatpush.msra.mxu2 %v630_v18 }
  0x2a   :  { %219 = vmatpush.msra.mxu3 %v630_v18  ;;  %228 = vmatpush.msrb.mxu1 %v543_v1 }
  0x2b   :  { %252 = vmatpush.msrb.mxu2 %v543_v1  ;;  %313 = vmatpush.msrb.mxu0 %v618_v16 }
  0x2c   :  { %276 = vmatpush.msrb.mxu3 %v543_v1  ;;  %229 = vmatpush.msrb.mxu1 %v545_v2 }
  0x2d   :  { %253 = vmatpush.msrb.mxu2 %v545_v2  ;;  %314 = vmatpush.msrb.mxu0 %v624_v17 }
  0x2e   :  { %277 = vmatpush.msrb.mxu3 %v545_v2  ;;  %230 = vmatpush.msrb.mxu1 %v549_v3 }
  0x2f   :  { %254 = vmatpush.msrb.mxu2 %v549_v3  ;;  %315 = vmatpush.msrb.mxu0 %v630_v18 }
  0x30   :  { %278 = vmatpush.msrb.mxu3 %v549_v3  ;;  %231 = vmatpush.msrb.mxu1 %v554_v4 }
  0x31   :  { %255 = vmatpush.msrb.mxu2 %v554_v4  ;;  %406 = vmatmul.msk.f32.gmra.mxu0 %vm60_vm1, %v48_v20 }
  0x32   :  { %279 = vmatpush.msrb.mxu3 %v554_v4  ;;  %232 = vmatpush.msrb.mxu1 %v564_v7 }
  0x33   :  { %256 = vmatpush.msrb.mxu2 %v564_v7  ;;  %420 = vset.pattern.permute.xlu0 %v500_v6 }
  0x34   :  { %280 = vmatpush.msrb.mxu3 %v564_v7  ;;  %233 = vmatpush.msrb.mxu1 %v570_v8 }
  0x35   :  { %257 = vmatpush.msrb.mxu2 %v570_v8 }
  0x36   :  { %281 = vmatpush.msrb.mxu3 %v570_v8  ;;  %234 = vmatpush.msrb.mxu1 %v576_v9 }
  0x37   :  { %258 = vmatpush.msrb.mxu2 %v576_v9 }
  0x38   :  { %282 = vmatpush.msrb.mxu3 %v576_v9  ;;  %235 = vmatpush.msrb.mxu1 %v582_v10 }
  0x39   :  { %259 = vmatpush.msrb.mxu2 %v582_v10  ;;  %407 = vmatmul.msk.f32.gmra.mxu0 %vm60_vm1, %v49_v27 }
  0x3a   :  { %283 = vmatpush.msrb.mxu3 %v582_v10  ;;  %236 = vmatpush.msrb.mxu1 %v588_v11 }
  0x3b   :  { %260 = vmatpush.msrb.mxu2 %v588_v11 }
  0x3c   :  { %284 = vmatpush.msrb.mxu3 %v588_v11  ;;  %237 = vmatpush.msrb.mxu1 %v594_v12 }
  0x3d   :  { %261 = vmatpush.msrb.mxu2 %v594_v12 }
  0x3e   :  { %285 = vmatpush.msrb.mxu3 %v594_v12  ;;  %238 = vmatpush.msrb.mxu1 %v600_v13 }
  0x3f   :  { %262 = vmatpush.msrb.mxu2 %v600_v13 }
  0x40   :  { %286 = vmatpush.msrb.mxu3 %v600_v13  ;;  %239 = vmatpush.msrb.mxu1 %v606_v14 }
  0x41   :  { %263 = vmatpush.msrb.mxu2 %v606_v14  ;;  %408 = vmatmul.msk.f32.gmra.mxu0 %vm60_vm1, %v50_v33 }
  0x42   :  { %287 = vmatpush.msrb.mxu3 %v606_v14  ;;  %240 = vmatpush.msrb.mxu1 %v612_v15 }
  0x43   :  { %264 = vmatpush.msrb.mxu2 %v612_v15 }
  0x44   :  { %288 = vmatpush.msrb.mxu3 %v612_v15  ;;  %241 = vmatpush.msrb.mxu1 %v618_v16 }
  0x45   :  { %265 = vmatpush.msrb.mxu2 %v618_v16 }
  0x46   :  { %289 = vmatpush.msrb.mxu3 %v618_v16  ;;  %242 = vmatpush.msrb.mxu1 %v624_v17 }
  0x47   :  { %266 = vmatpush.msrb.mxu2 %v624_v17 }
  0x48   :  { %290 = vmatpush.msrb.mxu3 %v624_v17  ;;  %243 = vmatpush.msrb.mxu1 %v630_v18 }
  0x49   :  { %267 = vmatpush.msrb.mxu2 %v630_v18  ;;  %409 = vmatmul.msk.f32.gmra.mxu0 %vm60_vm1, %v51_v39 }
  0x4a   :  { %291 = vmatpush.msrb.mxu3 %v630_v18  ;;  %324 = vmatpush.msra.mxu1 %v543_v1 }
  0x4c   :  { %325 = vmatpush.msra.mxu1 %v545_v2 }
  0x4e   :  { %326 = vmatpush.msra.mxu1 %v549_v3  ;;  %v422_v3 = vld [vmem:[%s761_s4] ss:$0 sm:$0xff]  ;;  %s501_s4 = smov [#allocation8]  }
  0x4f   :  { %s392_s23 = sshll.u32 %s501_s4, 4  ;;  %s393_s23 = int_to_ptr.vmem [resolvable:$true] %s392_s23 }
  0x50   :  { %327 = vmatpush.msra.mxu1 %v554_v4 }
  0x51   :  { %410 = vmatmul.msk.f32.gmra.mxu0 %vm60_vm1, %v52_v45 }
  0x52   :  { %328 = vmatpush.msra.mxu1 %v564_v7  ;;  %v423_v7 = vld [vmem:[#allocation4] ss:$0 sm:$0xff] }
  0x54   :  { %329 = vmatpush.msra.mxu1 %v570_v8 }
  0x56   :  { %330 = vmatpush.msra.mxu1 %v576_v9 }
  0x58   :  { %331 = vmatpush.msra.mxu1 %v582_v10 }
  0x59   :  { %411 = vmatmul.msk.f32.gmra.mxu0 %vm60_vm1, %v53_v46 }
  0x5a   :  { %332 = vmatpush.msra.mxu1 %v588_v11 }
  0x5c   :  { %333 = vmatpush.msra.mxu1 %v594_v12 }
  0x5e   :  { %334 = vmatpush.msra.mxu1 %v600_v13 }
  0x60   :  { %335 = vmatpush.msra.mxu1 %v606_v14 }
  0x61   :  { %412 = vmatmul.msk.f32.gmra.mxu0 %vm60_vm1, %v54_v52 }
  0x62   :  { %336 = vmatpush.msra.mxu1 %v612_v15 }
  0x64   :  { %337 = vmatpush.msra.mxu1 %v618_v16 }
  0x66   :  { %338 = vmatpush.msra.mxu1 %v624_v17 }
  0x68   :  { %339 = vmatpush.msra.mxu1 %v630_v18 }
  0x8b   :  { %v106_v22 = vpop.f32.mrf.mxu0 }
  0x8c   :  { %v107_v23 = vadd.f32 %v717_v21, %v106_v22 }
  0xa6   :  { %v173_v24 = vpop.f32.mrf.mxu1 }
  0xa7   :  { %v176_v25 = vadd.f32 %v173_v24, %v107_v23 }
  0xa9   :  { %424 = vtanh.f32 %v176_v25 }
  0xae   :  { %v109_v28 = vpop.f32.mrf.mxu0 }
  0xaf   :  { %v425_v26 = vpop.eup %424  ;;  %v110_v29 = vadd.f32 %v717_v21, %v109_v28 }
  0xb0   :  { %196 = vmatmul.f32.vlgmr.msra.gmra.mxu2 %v425_v26 }
  0xb6   :  { %v112_v34 = vpop.f32.mrf.mxu0 }
  0xb7   :  { %v113_v35 = vadd.f32 %v717_v21, %v112_v34 }
  0xbe   :  { %v115_v40 = vpop.f32.mrf.mxu0 }
  0xbf   :  { %v116_v41 = vadd.f32 %v717_v21, %v115_v40 }
  0xc6   :  { %v118_v47 = vpop.f32.mrf.mxu0 }
  0xc7   :  { %v119_v48 = vadd.f32 %v717_v21, %v118_v47 }
  0xce   :  { %v121_v53 = vpop.f32.mrf.mxu0 }
  0xcf   :  { %v122_v54 = vadd.f32 %v717_v21, %v121_v53 }
  0xd6   :  { %v124_v58 = vpop.f32.mrf.mxu0 }
  0xd7   :  { %v125_v60 = vadd.f32 %v717_v21, %v124_v58 }
  0xde   :  { %v127_v59 = vpop.f32.mrf.mxu0 }
  0xdf   :  { %v128_v0 = vadd.f32 %v717_v21, %v127_v59 }
 0x133   :  { %v197_v30 = vpop.f32.mrf.mxu2 }
 0x134   :  { %v200_v31 = vadd.f32 %v197_v30, %v110_v29 }
 0x136   :  { %426 = vtanh.f32 %v200_v31 }
 0x13c   :  { %v427_v32 = vpop.eup %426 }
 0x13d   :  { %220 = vmatmul.f32.vlgmr.msra.gmra.mxu3 %v427_v32 }
 0x1c0   :  { %v221_v36 = vpop.f32.mrf.mxu3 }
 0x1c1   :  { %v224_v37 = vadd.f32 %v221_v36, %v113_v35 }
 0x1c3   :  { %428 = vtanh.f32 %v224_v37 }
 0x1c9   :  { %v429_v38 = vpop.eup %428 }
 0x1ca   :  { %244 = vmatmul.f32.vlgmr.msrb.gmra.mxu1 %v429_v38 }
 0x247   :  { %v245_v42 = vpop.f32.mrf.mxu1 }
 0x248   :  { %v248_v43 = vadd.f32 %v245_v42, %v116_v41 }
 0x24a   :  { %430 = vtanh.f32 %v248_v43 }
 0x250   :  { %v431_v44 = vpop.eup %430 }
 0x251   :  { %268 = vmatmul.f32.vlgmr.msrb.gmra.mxu2 %v431_v44 }
 0x2d4   :  { %v269_v49 = vpop.f32.mrf.mxu2 }
 0x2d5   :  { %v272_v50 = vadd.f32 %v269_v49, %v119_v48 }
 0x2d7   :  { %432 = vtanh.f32 %v272_v50 }
 0x2dd   :  { %v433_v51 = vpop.eup %432 }
 0x2de   :  { %292 = vmatmul.f32.vlgmr.msrb.gmra.mxu3 %v433_v51 }
 0x361   :  { %v293_v55 = vpop.f32.mrf.mxu3 }
 0x362   :  { %v296_v56 = vadd.f32 %v293_v55, %v122_v54 }
 0x364   :  { %434 = vtanh.f32 %v296_v56 }
 0x36a   :  { %v435_v57 = vpop.eup %434 }
 0x36b   :  { %316 = vmatmul.f32.vlgmr.msrb.gmra.mxu0 %v435_v57 }
 0x3e8   :  { %v317_v61 = vpop.f32.mrf.mxu0 }
 0x3e9   :  { %v320_v62 = vadd.f32 %v317_v61, %v125_v60 }
 0x3eb   :  { %436 = vtanh.f32 %v320_v62 }
 0x3f1   :  { %v437_v63 = vpop.eup %436 }
 0x3f2   :  { %340 = vmatmul.f32.vlgmr.msra.gmra.mxu1 %v437_v63 }
 0x46f   :  { %v341_v1 = vpop.f32.mrf.mxu1 }
 0x470   :  { %v344_v2 = vadd.f32 %v341_v1, %v128_v0 }
 0x472   :  { %438 = vtanh.f32 %v344_v2 }
 0x478   :  { %v439_v4 = vpop.eup %438 }
 0x479   :  { %v354_v5 = vmul.f32 %v439_v4, %v422_v3 }
 0x47b   :  { %355 = vadd.xlane.f32.xlu0 %v354_v5 }
 0x4ee   :  { %v356_v8 = vpop.xlane.xlu0 %355 }
 0x4ef   :  { %v361_v9 = vadd.f32 %v423_v7, %v356_v8 }
 0x4f1   :  { %v413_v10 = vmul.f32 -1.442695, %v361_v9 }
 0x4f3   :  { %440 = vpow2.f32 %v413_v10 }
 0x4f9   :  { %v441_v11 = vpop.eup %440 }
 0x4fa   :  { %v365_v12 = vadd.f32 1.0, %v441_v11 }
 0x4fc   :  { %442 = vrcp.f32 %v365_v12  ;;  %v377_v16 = vand.u32 2147483648, %v365_v12  ;;  %v375_v18 = vand.u32 2147483647, %v365_v12  ;;  %vm371_vm3 = vweird.f32 %v365_v12 }
 0x4fe   :  { %v378_v20 = vor.u32 1.1754944e-38, %v377_v16  ;;  %vm376_vm5 = vcmp.eq.f32.partialorder %v375_v18, 8.507059e+37 }
 0x502   :  { %v443_v13 = vpop.eup %442 }
 0x503   :  { %v367_v14 = vmul.f32 %v443_v13, %v365_v12  ;;  %vm372_vm2 = vweird.f32 %v443_v13 }
 0x504   :  { %vm373_vm4 = vmor %vm371_vm3, %vm372_vm2 }
 0x505   :  { %v368_v15 = vsub.f32 1.0, %v367_v14 }
 0x507   :  { %v369_v17 = vmul.f32 %v443_v13, %v368_v15 }
 0x509   :  { %v370_v19 = vadd.f32 %v443_v13, %v369_v17 }
 0x50b   :  { %v374_v21 = vsel %vm373_vm4, %v443_v13, %v370_v19 }
 0x50c   :  { %v379_v22 = vsel %vm376_vm5, %v378_v20, %v374_v21 }
 0x50d   :  { %383 = vperm.xlu0 %420, %v379_v22  }
 0x57f   :  { %v384_v23 = vpop.permute.xlu0 %383 }
 0x580   :  { %386 = vst [vmem:[#allocation8] sm:$0xff] %v384_v23 }
 0x581   :  { %397 = dma.vmem_to_hbm [thread:$0]  %s393_s23, 128, %s395_s26, [#allocation7]  }
 0x582   :  { %494 = dma.done.wait [#allocation7], 128  }
 0x583   :  { %495 = vsyncadd [#allocation7], 4294967168 }
 0x584   :  { %402 = vsyncpa [#allocation6], 1 }
 0x585   :  { %403 = vsyncpa [#allocation7], 1 }

</bundles_post_ra>
